<compile_context>
chip_gen: v6e
topology: v6e:2x2x1
jax: 0.10.0
libtpu: 0.0.40
codegen_flags: <defaults>
</compile_context>

<pallas_src>
from math import sqrt

import numpy as np
import jax
import jax.numpy as jnp
from jax.experimental import pallas as pl
from jax.experimental.pallas import tpu as pltpu

# ---------------------------------------------------------------------------
# Irreps configuration (small, but exercises both a scalar and a vector block)
#   irreps_in1 = "8x0e + 8x1o"   -> dim 8 + 24 = 32
#   irreps_out = "16x0e + 8x1o"  -> dim 16 + 24 = 40
#   irreps_in2 = "1x0e"          (module default when irreps_in2 is None)
# ---------------------------------------------------------------------------
IRREPS_IN1 = ((8, 0), (8, 1))    # (multiplicity, l)
IRREPS_OUT = ((16, 0), (8, 1))
TP_RESCALE = True

LANE = 128


def _round_up(x, m):
    return ((x + m - 1) // m) * m


def _irreps_dim(irreps):
    return sum(mul * (2 * l + 1) for mul, l in irreps)


def _irreps_slices(irreps):
    slices, off = [], 0
    for mul, l in irreps:
        d = mul * (2 * l + 1)
        slices.append((off, off + d))
        off += d
    return slices


def init_o3_tensor_product_params(key, irreps_in1, irreps_out, tp_rescale=True):
    """Deterministic re-implementation of tensor_product_init() + vectorise().

    Returns a dict with:
      M_pad    : [dim_in1, d_out_pad]  dense matrix with path weights, e3nn path
                 normalisation, the wigner(l,0,l) factor AND the 1/sqrt_k
                 rescale folded in; columns zero-padded to a multiple of 128.
      bias_pad : [1, d_out_pad]  bias on l=0 slices (zero elsewhere / padding).
      d_out    : true output dimension (before lane padding).
      M, corr, bias : unfolded quantities, for reference checks only.
    """
    d_in, d_out = _irreps_dim(irreps_in1), _irreps_dim(irreps_out)
    in_slices, out_slices = _irreps_slices(irreps_in1), _irreps_slices(irreps_out)

    # Instructions of FullyConnectedTensorProduct(irreps_in1, "1x0e", irreps_out):
    # one 'uvw' path for each (in1 group, out group) with the same irrep.
    instrs = [(i1, io)
              for i1, (_, l1) in enumerate(irreps_in1)
              for io, (_, lo) in enumerate(irreps_out)
              if l1 == lo]

    # fan_in per output slice = sum over its paths of mul_1 * mul_2 (mul_2 = 1)
    fan_in = {}
    for i1, io in instrs:
        fan_in[io] = fan_in.get(io, 0) + irreps_in1[i1][0]

    keys = jax.random.split(key, len(instrs) + len(irreps_out))
    M = np.zeros((d_in, d_out), np.float32)

    for p, (i1, io) in enumerate(instrs):
        mul1, l = irreps_in1[i1]
        mulo, _ = irreps_out[io]
        sqrt_k = 1.0 / sqrt(fan_in[io]) if tp_rescale else 1.0
        # weight.data.uniform_(-sqrt_k, sqrt_k)
        w = np.asarray(jax.random.uniform(keys[p], (mul1, mulo),
                                          minval=-sqrt_k, maxval=sqrt_k),
                       np.float32)
        # e3nn 'component' path coefficient sqrt((2l+1)/fan) times the
        # wigner_3j(l,0,l) factor 1/sqrt(2l+1)  ->  1/sqrt(fan).
        coef = 1.0 / sqrt(fan_in[io])
        ir_dim = 2 * l + 1
        blk = np.kron(w, np.eye(ir_dim, dtype=np.float32)) * coef
        s1, so = in_slices[i1], out_slices[io]
        M[s1[0]:s1[1], so[0]:so[1]] += blk

    # sqrt_k_correction buffer (per output slice)
    corr = np.zeros((d_out,), np.float32)
    for io in range(len(irreps_out)):
        sqrt_k = 1.0 / sqrt(fan_in[io]) if tp_rescale else 1.0
        so = out_slices[io]
        corr[so[0]:so[1]] = sqrt_k

    # biases on l == 0 output slices (vectorised as a zero-padded dense vector)
    bias_full = np.zeros((d_out,), np.float32)
    for io, (mulo, lo) in enumerate(irreps_out):
        if lo == 0:
            sqrt_k = 1.0 / sqrt(fan_in[io])
            b = np.asarray(jax.random.uniform(keys[len(instrs) + io], (mulo,),
                                              minval=-sqrt_k, maxval=sqrt_k),
                           np.float32)
            so = out_slices[io]
            bias_full[so[0]:so[1]] = b

    # ---- fold the rescale divide into the weight matrix (init-time algebra) --
    # module: data_out = tp(x1, x2); if tp_rescale: data_out /= corr; +bias
    # Guard against output slices with no instruction (corr == 0).
    corr_safe = np.where(corr > 0, corr, 1.0).astype(np.float32)
    M_eff = (M / corr_safe[None, :]) if tp_rescale else M

    # ---- zero-pad output columns to a lane-dense multiple of 128 ------------
    d_out_pad = max(LANE, _round_up(d_out, LANE))
    M_pad = np.zeros((d_in, d_out_pad), np.float32)
    M_pad[:, :d_out] = M_eff
    bias_pad = np.zeros((1, d_out_pad), np.float32)
    bias_pad[0, :d_out] = bias_full

    return dict(
        M_pad=jnp.asarray(M_pad),
        bias_pad=jnp.asarray(bias_pad),
        d_out=d_out,
        M=jnp.asarray(M),
        corr=jnp.asarray(corr).reshape(1, d_out),
        bias=jnp.asarray(bias_full).reshape(1, d_out),
    )


# ---------------------------------------------------------------------------
# Pallas kernels: the hot path of forward_tp_rescale_bias.
# Rescale is pre-folded into w; bias is zero on non-l=0 / padding columns.
# ---------------------------------------------------------------------------
def _o3_tp_kernel(x1_ref, w_ref, bias_ref, o_ref):
    # data_in2 is None path: the implicit all-ones scalar is a no-op, skip it.
    y = jnp.dot(x1_ref[...], w_ref[...], preferred_element_type=jnp.float32)
    o_ref[...] = (y + bias_ref[...]).astype(o_ref.dtype)


def _o3_tp_kernel_x2(x1_ref, x2_ref, w_ref, bias_ref, o_ref):
    # Scale the narrow (d_in) input instead of the wide (d_out_pad) MXU output.
    x = x1_ref[...] * x2_ref[...]
    y = jnp.dot(x, w_ref[...], preferred_element_type=jnp.float32)
    o_ref[...] = (y + bias_ref[...]).astype(o_ref.dtype)


def o3_tensor_product(data_in1, data_in2, params, *, block_n=None, out_dtype=None):
    """Forward pass of O3TensorProduct (irreps_in2='1x0e')."""
    M_pad, bias_pad, d_out = params["M_pad"], params["bias_pad"], params["d_out"]
    n, d_in = data_in1.shape
    d_out_pad = M_pad.shape[1]
    if out_dtype is None:
        out_dtype = data_in1.dtype

    if block_n is None:
        # Large tiles to approach the HBM roofline (per-step overhead ~0.35us),
        # but keep >= 2 grid steps so v7x's 2 TensorCores both get work.
        block_n = min(1024, max(8, _round_up(pl.cdiv(n, 2), 8)))

    # Handle arbitrary batch sizes: zero-pad rows, slice the result back.
    n_pad = _round_up(n, block_n)
    x1 = data_in1 if n_pad == n else jnp.pad(data_in1, ((0, n_pad - n), (0, 0)))

    grid = (n_pad // block_n,)
    x1_spec = pl.BlockSpec((block_n, d_in), lambda i: (i, 0))
    w_spec = pl.BlockSpec((d_in, d_out_pad), lambda i: (0, 0))
    b_spec = pl.BlockSpec((1, d_out_pad), lambda i: (0, 0))
    out_spec = pl.BlockSpec((block_n, d_out_pad), lambda i: (i, 0))
    out_shape = jax.ShapeDtypeStruct((n_pad, d_out_pad), out_dtype)
    cparams = pltpu.CompilerParams(dimension_semantics=("parallel",))

    if data_in2 is None:
        # torch: data_in2 = torch.ones_like(data_in1[:, 0:1])  ->  multiply by 1
        # is a no-op, so skip the DMA and the broadcast multiply entirely.
        out = pl.pallas_call(
            _o3_tp_kernel,
            out_shape=out_shape,
            grid=grid,
            in_specs=[x1_spec, w_spec, b_spec],
            out_specs=out_spec,
            compiler_params=cparams,
        )(x1, M_pad, bias_pad)
    else:
        x2 = data_in2 if n_pad == n else jnp.pad(data_in2, ((0, n_pad - n), (0, 0)))
        x2_spec = pl.BlockSpec((block_n, 1), lambda i: (i, 0))
        out = pl.pallas_call(
            _o3_tp_kernel_x2,
            out_shape=out_shape,
            grid=grid,
            in_specs=[x1_spec, x2_spec, w_spec, b_spec],
            out_specs=out_spec,
            compiler_params=cparams,
        )(x1, x2, M_pad, bias_pad)

    # Drop row padding and the lane-padding columns.
    return out[:n, :d_out]


if __name__ == "__main__":
    key = jax.random.PRNGKey(0)
    k_param, k_x, k_x2 = jax.random.split(key, 3)

    params = init_o3_tensor_product_params(k_param, IRREPS_IN1, IRREPS_OUT,
                                           tp_rescale=TP_RESCALE)

    N = 1000                                # non-multiple batch -> exercises row padding
    D_IN = _irreps_dim(IRREPS_IN1)          # 32
    D_OUT = _irreps_dim(IRREPS_OUT)         # 40
    data_in1 = jax.random.normal(k_x, (N, D_IN), jnp.float32)
    data_in2 = jax.random.normal(k_x2, (N, 1), jnp.float32)

    # --- path 1: data_in2 = None (module default) ---
    out_none = jax.block_until_ready(o3_tensor_product(data_in1, None, params))
    # --- path 2: explicit scalar second input ---
    out_x2 = jax.block_until_ready(o3_tensor_product(data_in1, data_in2, params))

    # Pure-JAX reference of the original (unfolded) math.
    M, corr, bias = params["M"], params["corr"], params["bias"]
    ref_none = (data_in1 @ M) / corr + bias
    ref_x2 = ((data_in1 @ M) * data_in2) / corr + bias

    assert out_none.shape == (N, D_OUT)
    assert out_x2.shape == (N, D_OUT)
    assert jnp.allclose(out_none, ref_none, atol=2e-5, rtol=2e-5)
    assert jnp.allclose(out_x2, ref_x2, atol=2e-5, rtol=2e-5)

    print("KERNEL_OK")
</pallas_src>

<mosaic_0001>
module attributes {stable_mosaic.version = 11 : i64} {
  func.func @_o3_tp_kernel(%arg0: i32, %arg1: memref<504x32xf32, #tpu.memory_space<vmem>>, %arg2: memref<32x128xf32, #tpu.memory_space<vmem>>, %arg3: memref<1x128xf32, #tpu.memory_space<vmem>>, %arg4: memref<504x128xf32, #tpu.memory_space<vmem>>) attributes {dimension_semantics = [#tpu.dimension_semantics<parallel>], iteration_bounds = array<i64: 2>, scalar_prefetch = 0 : i64, scratch_operands = 0 : i64, tpu.core_type = #tpu.core_type<tc>, window_params = [{transform_indices = @transform_0, window_bounds = array<i64: 504, 32>}, {pipeline_mode = #tpu.pipeline_mode<synchronous>, transform_indices = @transform_1, window_bounds = array<i64: 32, 128>}, {pipeline_mode = #tpu.pipeline_mode<synchronous>, transform_indices = @transform_2, window_bounds = array<i64: 1, 128>}, {transform_indices = @transform_3, window_bounds = array<i64: 504, 128>}]} {
    %c0 = arith.constant 0 : index
    %c0_0 = arith.constant 0 : index
    %0 = vector.load %arg1[%c0, %c0_0] : memref<504x32xf32, #tpu.memory_space<vmem>>, vector<504x32xf32>
    %c0_1 = arith.constant 0 : index
    %c0_2 = arith.constant 0 : index
    %1 = vector.load %arg2[%c0_1, %c0_2] : memref<32x128xf32, #tpu.memory_space<vmem>>, vector<32x128xf32>
    %cst = arith.constant dense<0.000000e+00> : vector<504x128xf32>
    %2 = tpu.matmul %0, %1, %cst {dimension_numbers = #tpu.dot_dimension_numbers<[1], [0], [0], [1], [0, 0, 1, 1], [], []>} : vector<504x32xf32>, vector<32x128xf32>, vector<504x128xf32> -> vector<504x128xf32>
    %c0_3 = arith.constant 0 : index
    %c0_4 = arith.constant 0 : index
    %3 = vector.load %arg3[%c0_3, %c0_4] : memref<1x128xf32, #tpu.memory_space<vmem>>, vector<1x128xf32>
    %4 = vector.broadcast %3 : vector<1x128xf32> to vector<504x128xf32>
    %5 = arith.addf %2, %4 : vector<504x128xf32>
    %c0_5 = arith.constant 0 : index
    %c0_6 = arith.constant 0 : index
    %6 = vector.load %arg4[%c0_5, %c0_6] : memref<504x128xf32, #tpu.memory_space<vmem>>, vector<504x128xf32>
    tpu.vector_store %arg4[%c0_5, %c0_6], %5 {strides = array<i32>} : memref<504x128xf32, #tpu.memory_space<vmem>>, vector<504x128xf32>,
    return
  }
  func.func @transform_0(%arg0: i32) -> (i32, i32) {
    %c0_i32 = arith.constant 0 : i32
    %c0_i32_0 = arith.constant 0 : i32
    return %arg0, %c0_i32 : i32, i32
  }
  func.func @transform_1(%arg0: i32) -> (i32, i32) {
    %c0_i32 = arith.constant 0 : i32
    %c0_i32_0 = arith.constant 0 : i32
    %c0_i32_1 = arith.constant 0 : i32
    return %c0_i32, %c0_i32_0 : i32, i32
  }
  func.func @transform_2(%arg0: i32) -> (i32, i32) {
    %c0_i32 = arith.constant 0 : i32
    %c0_i32_0 = arith.constant 0 : i32
    %c0_i32_1 = arith.constant 0 : i32
    return %c0_i32, %c0_i32_0 : i32, i32
  }
  func.func @transform_3(%arg0: i32) -> (i32, i32) {
    %c0_i32 = arith.constant 0 : i32
    %c0_i32_0 = arith.constant 0 : i32
    return %arg0, %c0_i32 : i32, i32
  }
}

</mosaic_0001>

<bundles_post_ra>
// kernel: tpu_custom_call.1
= control target key start
LH: loop header
LB: loop body
LE: loop exit
PB: predicated region body
PF: predicated region fallthrough
CT: control target
= control target key end

     0   :  { %8 = vsyncpa [#allocation3], 0  ;;  %s1944_s0 = inlined_call_operand.vmem [shape: f32[1008,32], index: 0, kind: input, shape index: {}]   ;;  %s1945_s1 = inlined_call_operand.vmem [shape: f32[32,128], index: 1, kind: input, shape index: {}]   ;;  %s1946_s2 = inlined_call_operand.vmem [shape: f32[1,128], index: 2, kind: input, shape index: {}]   ;;  %s1947_s3 = inlined_call_operand.hbm [shape: f32[1008,128], index: 3, kind: output, shape index: {}]  }
   0x1   :  { %10 = vsyncpa [#allocation3 + $0x1], 0  ;;  %s1431_s12 = smov 0   ;;  %s1433_s13 = smov 0  }
   0x2   :  { %s1435_s14 = smov 0   ;;  %s1437_s15 = smov 0  }
   0x3 LB: > { %s1452_s16 = sadd.s32 4294967295, %s1404_s15   ;;  %s955_s17 = sadd.s32 4294967294, %s1404_s15   ;;  %s1404_s15 = sphi %s1437_s15, %s1953_s15   ;;  %s1400_s14 = sphi %s1435_s14, %s1952_s14   ;;  %s1396_s13 = sphi %s1433_s13, %s1951_s13   ;;  %s1392_s12 = sphi %s1431_s12, %s1950_s12  }
   0x4   : > { %s1456_s18 = sadd.s32 1, %s1404_s15   ;;  %s91_s19 = sadd.s32 1, %s1400_s14 }
   0x5   : > { %s88_s20 = ssub.s32 %s1404_s15, %s1456_s18  ;;  %p101_p0 = scmp.ne.s32.totalorder %s1400_s14, %s1396_s13 }
   0x6   : > { %p89_p1 = scmp.eq.s32.totalorder %s88_s20, 0  ;;  %p102_p2 = scmp.eq.s32.totalorder %s1452_s16, 1 }
   0x7   : > { %p107_p3 = scmp.ne.s32.totalorder %s1396_s13, %s1392_s12  ;;  %p108_p4 = scmp.eq.s32.totalorder %s955_s17, 1 }
   0x8   : > { %s1467_s21 = scalar_select %p89_p1, %s1400_s14, %s91_s19  }
   0x9   : > { %p1469_p5 = por %p102_p2, %p101_p0  ;;  %p1473_p6 = por %p108_p4, %p107_p3 }
   0xa   : > { %p958_p7 = scmp.ge.s32.totalorder %s1404_s15, 1  ;;  %p141_p8 = scmp.lt.s32.totalorder %s1404_s15, 3 }
   0xc   : > { %p142_p9 = pnand %p958_p7, %p141_p8 }
   0xd   : > { %s165_s26 = smul.u32 (!%p142_p9), 63, %s1452_s16  ;;  %s162_s10 = sand.u32 (!%p142_p9), 1, %s1396_s13  }
   0xe   : > { %145 = sbr.rel (%p142_p9) target bundleno = 361 (0x169), region = 32  ;;  %s1408_s30 = smov (!%p142_p9), [#allocation2]  }
   0xf   : > { %p166_p10 = scmp.lt.s32.totalorder (!%p142_p9), %s165_s26, 125  ;;  %s1300_s11 = smul.u32 (!%p142_p9), 504, %s162_s10 }
  0x10   : > { %s1027_s24 = smul.u32 (!%p142_p9), 8064, %s1452_s16  ;;  %s1904_s16 = scalar_lea.sflag (!%p142_p9), [#allocation3], %s162_s10 }
  0x11   : > { %s1766_s20 = scalar_lea.vmem (!%p142_p9), [#allocation2], %s1300_s11  ;;  %s1348_s4 = sshll.u32 (!%p142_p9), %s1408_s30, 4  ;;  %s1349_s4 = int_to_ptr.vmem [resolvable:$false] %s1348_s4 }
  0x12   : > { %s893_s25 = sshll.u32 (!%p142_p9), %s1766_s20, 4  ;;  %s1895_s28 = scalar_lea.hbm (!%p142_p9), %s1947_s3, %s1027_s24  ;;  %s1897_s25 = int_to_ptr.vmem [resolvable:$true] %s893_s25 }
  0x13   : > { %v238_v0 = vld [vmem:[%s1945_s1 + $0x18] sm:$0xff]  ;;  %v1406_v1 = vmov 0.0   ;;  %v237_v2 = vld [vmem:[%s1945_s1 + $0x10] sm:$0xff]  ;;  %v236_v3 = vld [vmem:[%s1945_s1 + $0x8] sm:$0xff]  ;;  %s1955_s26 = smov (!%p166_p10, %s165_s26), 125  ;;  %vm246_vm0 = vcmask 261120   ;;  %p1351_p0 = scmp.lt.s32.totalorder %s1897_s25, %s1349_s4 }
  0x14   : > { %1095 = vmatprep.subr.mxu0 %v1406_v1  ;;  %1292 = vmatprep.subr.mxu1 %v1406_v1  ;;  %v235_v4 = vld [vmem:[%s1945_s1] sm:$0xff]  ;;  %s959_s6 = sshll.u32 %s1955_s26, 3  ;;  %vm1407_vm1 = vmmov 0   ;;  %s1344_s29 = scalar_lea.vmem %s1897_s25, 8064 }
  0x15   : > { %1096 = vmatpush3.msra.mxu0 %v238_v0  ;;  %1296 = vmatpush3.msra.mxu1 %v238_v0  ;;  %s1504_s9 = scalar_lea.vmem %s1944_s0, %s959_s6  ;;  %p1345_p11 = scmp.ne.s32.totalorder %s1897_s25, %s1344_s29 }
  0x16   : > { %1097 = vmatprep.subr.mxu0 %v1406_v1  ;;  %1293 = vmatprep.subr.mxu1 %v1406_v1  ;;  %v172_v5 = vld [vmem:[%s1504_s9] sm:$0xff]  ;;  %v173_v7 = vld [vmem:[%s1504_s9 + $0x8] sm:$0xff]  ;;  %v174_v9 = vld [vmem:[%s1504_s9 + $0x10] sm:$0xff]  ;;  %s1350_s5 = scalar_lea.vmem %s1349_s4, 16128 }
  0x17   : > { %1098 = vmatpush3.msra.mxu0 %v237_v2  ;;  %1297 = vmatpush3.msra.mxu1 %v237_v2  ;;  %v204_v6 = vld [vmem:[%s1504_s9 + $0x100] sm:$0xff]  ;;  %v205_v8 = vld [vmem:[%s1504_s9 + $0x108] sm:$0xff]  ;;  %v206_v10 = vld [vmem:[%s1504_s9 + $0x110] sm:$0xff]  ;;  %p1346_p12 = pnand %p1345_p11, %p1469_p5  ;;  %p1352_p1 = scmp.lt.s32.totalorder %s1350_s5, %s1344_s29 }
  0x18   : > { %1099 = vmatprep.subr.mxu0 %v1406_v1  ;;  %1294 = vmatprep.subr.mxu1 %v1406_v1  ;;  %v175_v11 = vld [vmem:[%s1504_s9 + $0x18] sm:$0xff]  ;;  %v176_v13 = vld [vmem:[%s1504_s9 + $0x20] sm:$0xff]  ;;  %v177_v15 = vld [vmem:[%s1504_s9 + $0x28] sm:$0xff] }
  0x19   : > { %1100 = vmatpush3.msra.mxu0 %v236_v3  ;;  %1298 = vmatpush3.msra.mxu1 %v236_v3  ;;  %v207_v12 = vld [vmem:[%s1504_s9 + $0x118] sm:$0xff]  ;;  %v208_v14 = vld [vmem:[%s1504_s9 + $0x120] sm:$0xff]  ;;  %v209_v16 = vld [vmem:[%s1504_s9 + $0x128] sm:$0xff]  ;;  %p1347_p13 = pneg %p1346_p12  ;;  %p1353_p2 = por %p1352_p1, %p1351_p0 }
  0x1a   : > { %1101 = vmatprep.subr.mxu0 %v1406_v1  ;;  %1103 = vmatprep.mubr.msk.f32.mxu0 %vm1407_vm1, %v1406_v1  ;;  %v178_v17 = vld [vmem:[%s1504_s9 + $0x30] sm:$0xff]  ;;  %v179_v19 = vld [vmem:[%s1504_s9 + $0x38] sm:$0xff]  ;;  %v180_v21 = vld [vmem:[%s1504_s9 + $0x40] sm:$0xff] }
  0x1b   : > { %1102 = vmatpush3.msra.mxu0 %v235_v4  ;;  %1295 = vmatprep.subr.mxu1 %v1406_v1  ;;  %v210_v18 = vld [vmem:[%s1504_s9 + $0x130] sm:$0xff]  ;;  %v211_v20 = vld [vmem:[%s1504_s9 + $0x138] sm:$0xff]  ;;  %v212_v22 = vld [vmem:[%s1504_s9 + $0x140] sm:$0xff]  ;;  %p1354_p3 = pnand %p1353_p2, %p1347_p13 }
  0x1c   : > { %1104 = vmatmul.mubr.msk.f32.vlgmr.msra.gmra.mxu0 %vm246_vm0, %v172_v5  ;;  %1299 = vmatpush3.msra.mxu1 %v235_v4  ;;  %v181_v23 = vld [vmem:[%s1504_s9 + $0x48] sm:$0xff]  ;;  %v182_v25 = vld [vmem:[%s1504_s9 + $0x50] sm:$0xff]  ;;  %v183_v27 = vld [vmem:[%s1504_s9 + $0x58] sm:$0xff] }
  0x1d   : > { %1199 = vmatprep.mubr.msk.f32.mxu1 %vm1407_vm1, %v1406_v1  ;;  %1106 = vmatprep.mubr.msk.f32.mxu0 %vm1407_vm1, %v1406_v1  ;;  %v213_v24 = vld [vmem:[%s1504_s9 + $0x148] sm:$0xff]  ;;  %v214_v26 = vld [vmem:[%s1504_s9 + $0x150] sm:$0xff]  ;;  %v215_v28 = vld [vmem:[%s1504_s9 + $0x158] sm:$0xff] }
  0x1e   : > { %1200 = vmatmul.mubr.msk.f32.vlgmr.msra.gmra.mxu1 %vm246_vm0, %v204_v6  ;;  %v184_v29 = vld [vmem:[%s1504_s9 + $0x60] sm:$0xff]  ;;  %v185_v31 = vld [vmem:[%s1504_s9 + $0x68] sm:$0xff]  ;;  %v186_v33 = vld [vmem:[%s1504_s9 + $0x70] sm:$0xff] }
  0x1f   : > { %1202 = vmatprep.mubr.msk.f32.mxu1 %vm1407_vm1, %v1406_v1  ;;  %v216_v30 = vld [vmem:[%s1504_s9 + $0x160] sm:$0xff]  ;;  %v217_v32 = vld [vmem:[%s1504_s9 + $0x168] sm:$0xff]  ;;  %v218_v34 = vld [vmem:[%s1504_s9 + $0x170] sm:$0xff] }
  0x20   : > { %1107 = vmatmul.mubr.msk.f32.gmra.mxu0 %vm246_vm0, %v173_v7  ;;  %v187_v35 = vld [vmem:[%s1504_s9 + $0x78] sm:$0xff]  ;;  %v188_v37 = vld [vmem:[%s1504_s9 + $0x80] sm:$0xff]  ;;  %v189_v39 = vld [vmem:[%s1504_s9 + $0x88] sm:$0xff] }
  0x21   : > { %1109 = vmatprep.mubr.msk.f32.mxu0 %vm1407_vm1, %v1406_v1  ;;  %v219_v36 = vld [vmem:[%s1504_s9 + $0x178] sm:$0xff]  ;;  %v220_v38 = vld [vmem:[%s1504_s9 + $0x180] sm:$0xff]  ;;  %v221_v40 = vld [vmem:[%s1504_s9 + $0x188] sm:$0xff] }
  0x22   : > { %1203 = vmatmul.mubr.msk.f32.gmra.mxu1 %vm246_vm0, %v205_v8  ;;  %v190_v41 = vld [vmem:[%s1504_s9 + $0x90] sm:$0xff]  ;;  %v191_v43 = vld [vmem:[%s1504_s9 + $0x98] sm:$0xff]  ;;  %v192_v45 = vld [vmem:[%s1504_s9 + $0xa0] sm:$0xff] }
  0x23   : > { %1205 = vmatprep.mubr.msk.f32.mxu1 %vm1407_vm1, %v1406_v1  ;;  %v222_v42 = vld [vmem:[%s1504_s9 + $0x190] sm:$0xff]  ;;  %v223_v44 = vld [vmem:[%s1504_s9 + $0x198] sm:$0xff]  ;;  %v224_v46 = vld [vmem:[%s1504_s9 + $0x1a0] sm:$0xff] }
  0x24   : > { %1110 = vmatmul.mubr.msk.f32.gmra.mxu0 %vm246_vm0, %v174_v9  ;;  %v193_v47 = vld [vmem:[%s1504_s9 + $0xa8] sm:$0xff]  ;;  %v194_v49 = vld [vmem:[%s1504_s9 + $0xb0] sm:$0xff]  ;;  %v195_v51 = vld [vmem:[%s1504_s9 + $0xb8] sm:$0xff] }
  0x25   : > { %1112 = vmatprep.mubr.msk.f32.mxu0 %vm1407_vm1, %v1406_v1  ;;  %v225_v48 = vld [vmem:[%s1504_s9 + $0x1a8] sm:$0xff]  ;;  %v226_v50 = vld [vmem:[%s1504_s9 + $0x1b0] sm:$0xff]  ;;  %v227_v52 = vld [vmem:[%s1504_s9 + $0x1b8] sm:$0xff] }
  0x26   : > { %1206 = vmatmul.mubr.msk.f32.gmra.mxu1 %vm246_vm0, %v206_v10  ;;  %v196_v53 = vld [vmem:[%s1504_s9 + $0xc0] sm:$0xff]  ;;  %v197_v55 = vld [vmem:[%s1504_s9 + $0xc8] sm:$0xff]  ;;  %v198_v57 = vld [vmem:[%s1504_s9 + $0xd0] sm:$0xff] }
  0x27   : > { %1208 = vmatprep.mubr.msk.f32.mxu1 %vm1407_vm1, %v1406_v1  ;;  %v228_v54 = vld [vmem:[%s1504_s9 + $0x1c0] sm:$0xff]  ;;  %v229_v56 = vld [vmem:[%s1504_s9 + $0x1c8] sm:$0xff]  ;;  %v230_v58 = vld [vmem:[%s1504_s9 + $0x1d0] sm:$0xff] }
  0x28   : > { %1113 = vmatmul.mubr.msk.f32.gmra.mxu0 %vm246_vm0, %v175_v11  ;;  %v199_v59 = vld [vmem:[%s1504_s9 + $0xd8] sm:$0xff]  ;;  %v200_v61 = vld [vmem:[%s1504_s9 + $0xe0] sm:$0xff]  ;;  %v201_v63 = vld [vmem:[%s1504_s9 + $0xe8] sm:$0xff] }
  0x29   : > { %1115 = vmatprep.mubr.msk.f32.mxu0 %vm1407_vm1, %v1406_v1  ;;  %v231_v60 = vld [vmem:[%s1504_s9 + $0x1d8] sm:$0xff]  ;;  %v232_v62 = vld [vmem:[%s1504_s9 + $0x1e0] sm:$0xff]  ;;  %v233_v0 = vld [vmem:[%s1504_s9 + $0x1e8] sm:$0xff] }
  0x2a   : > { %1209 = vmatmul.mubr.msk.f32.gmra.mxu1 %vm246_vm0, %v207_v12  ;;  %v202_v2 = vld [vmem:[%s1504_s9 + $0xf0] sm:$0xff]  ;;  %v203_v4 = vld [vmem:[%s1504_s9 + $0xf8] sm:$0xff]  ;;  %v1763_v5 = vld [vmem:[%s1946_s2] ss:$0 sm:$0xff] }
  0x2b   : > { %1211 = vmatprep.mubr.msk.f32.mxu1 %vm1407_vm1, %v1406_v1  ;;  %v234_v3 = vld [vmem:[%s1504_s9 + $0x1f0] sm:$0xff] }
  0x2c   : > { %1116 = vmatmul.mubr.msk.f32.gmra.mxu0 %vm246_vm0, %v176_v13 }
  0x2d   : > { %1118 = vmatprep.mubr.msk.f32.mxu0 %vm1407_vm1, %v1406_v1 }
  0x2e   : > { %1212 = vmatmul.mubr.msk.f32.gmra.mxu1 %vm246_vm0, %v208_v14 }
  0x2f   : > { %1214 = vmatprep.mubr.msk.f32.mxu1 %vm1407_vm1, %v1406_v1 }
  0x30   : > { %1119 = vmatmul.mubr.msk.f32.gmra.mxu0 %vm246_vm0, %v177_v15 }
  0x31   : > { %1121 = vmatprep.mubr.msk.f32.mxu0 %vm1407_vm1, %v1406_v1 }
  0x32   : > { %1215 = vmatmul.mubr.msk.f32.gmra.mxu1 %vm246_vm0, %v209_v16 }
  0x33   : > { %1217 = vmatprep.mubr.msk.f32.mxu1 %vm1407_vm1, %v1406_v1 }
  0x34   : > { %1122 = vmatmul.mubr.msk.f32.gmra.mxu0 %vm246_vm0, %v178_v17 }
  0x35   : > { %1124 = vmatprep.mubr.msk.f32.mxu0 %vm1407_vm1, %v1406_v1 }
  0x36   : > { %1218 = vmatmul.mubr.msk.f32.gmra.mxu1 %vm246_vm0, %v210_v18 }
  0x37   : > { %1220 = vmatprep.mubr.msk.f32.mxu1 %vm1407_vm1, %v1406_v1 }
  0x38   : > { %1125 = vmatmul.mubr.msk.f32.gmra.mxu0 %vm246_vm0, %v179_v19 }
  0x39   : > { %1127 = vmatprep.mubr.msk.f32.mxu0 %vm1407_vm1, %v1406_v1 }
  0x3a   : > { %1221 = vmatmul.mubr.msk.f32.gmra.mxu1 %vm246_vm0, %v211_v20 }
  0x3b   : > { %1223 = vmatprep.mubr.msk.f32.mxu1 %vm1407_vm1, %v1406_v1 }
  0x3c   : > { %1128 = vmatmul.mubr.msk.f32.gmra.mxu0 %vm246_vm0, %v180_v21 }
  0x3d   : > { %1130 = vmatprep.mubr.msk.f32.mxu0 %vm1407_vm1, %v1406_v1 }
  0x3e   : > { %1224 = vmatmul.mubr.msk.f32.gmra.mxu1 %vm246_vm0, %v212_v22 }
  0x3f   : > { %1226 = vmatprep.mubr.msk.f32.mxu1 %vm1407_vm1, %v1406_v1 }
  0x40   : > { %1131 = vmatmul.mubr.msk.f32.gmra.mxu0 %vm246_vm0, %v181_v23 }
  0x41   : > { %1133 = vmatprep.mubr.msk.f32.mxu0 %vm1407_vm1, %v1406_v1 }
  0x42   : > { %1227 = vmatmul.mubr.msk.f32.gmra.mxu1 %vm246_vm0, %v213_v24 }
  0x43   : > { %1229 = vmatprep.mubr.msk.f32.mxu1 %vm1407_vm1, %v1406_v1 }
  0x44   : > { %1134 = vmatmul.mubr.msk.f32.gmra.mxu0 %vm246_vm0, %v182_v25 }
  0x45   : > { %1136 = vmatprep.mubr.msk.f32.mxu0 %vm1407_vm1, %v1406_v1 }
  0x46   : > { %1230 = vmatmul.mubr.msk.f32.gmra.mxu1 %vm246_vm0, %v214_v26 }
  0x47   : > { %1232 = vmatprep.mubr.msk.f32.mxu1 %vm1407_vm1, %v1406_v1 }
  0x48   : > { %1137 = vmatmul.mubr.msk.f32.gmra.mxu0 %vm246_vm0, %v183_v27 }
  0x49   : > { %1139 = vmatprep.mubr.msk.f32.mxu0 %vm1407_vm1, %v1406_v1 }
  0x4a   : > { %1233 = vmatmul.mubr.msk.f32.gmra.mxu1 %vm246_vm0, %v215_v28 }
  0x4b   : > { %1235 = vmatprep.mubr.msk.f32.mxu1 %vm1407_vm1, %v1406_v1 }
  0x4c   : > { %1140 = vmatmul.mubr.msk.f32.gmra.mxu0 %vm246_vm0, %v184_v29 }
  0x4d   : > { %1142 = vmatprep.mubr.msk.f32.mxu0 %vm1407_vm1, %v1406_v1 }
  0x4e   : > { %1236 = vmatmul.mubr.msk.f32.gmra.mxu1 %vm246_vm0, %v216_v30 }
  0x4f   : > { %1238 = vmatprep.mubr.msk.f32.mxu1 %vm1407_vm1, %v1406_v1 }
  0x50   : > { %1143 = vmatmul.mubr.msk.f32.gmra.mxu0 %vm246_vm0, %v185_v31 }
  0x51   : > { %1145 = vmatprep.mubr.msk.f32.mxu0 %vm1407_vm1, %v1406_v1 }
  0x52   : > { %1239 = vmatmul.mubr.msk.f32.gmra.mxu1 %vm246_vm0, %v217_v32 }
  0x53   : > { %1241 = vmatprep.mubr.msk.f32.mxu1 %vm1407_vm1, %v1406_v1 }
  0x54   : > { %1146 = vmatmul.mubr.msk.f32.gmra.mxu0 %vm246_vm0, %v186_v33 }
  0x55   : > { %1148 = vmatprep.mubr.msk.f32.mxu0 %vm1407_vm1, %v1406_v1 }
  0x56   : > { %1242 = vmatmul.mubr.msk.f32.gmra.mxu1 %vm246_vm0, %v218_v34 }
  0x57   : > { %1244 = vmatprep.mubr.msk.f32.mxu1 %vm1407_vm1, %v1406_v1 }
  0x58   : > { %1149 = vmatmul.mubr.msk.f32.gmra.mxu0 %vm246_vm0, %v187_v35 }
  0x59   : > { %1151 = vmatprep.mubr.msk.f32.mxu0 %vm1407_vm1, %v1406_v1 }
  0x5a   : > { %1245 = vmatmul.mubr.msk.f32.gmra.mxu1 %vm246_vm0, %v219_v36 }
  0x5b   : > { %1247 = vmatprep.mubr.msk.f32.mxu1 %vm1407_vm1, %v1406_v1 }
  0x5c   : > { %1152 = vmatmul.mubr.msk.f32.gmra.mxu0 %vm246_vm0, %v188_v37 }
  0x5d   : > { %1154 = vmatprep.mubr.msk.f32.mxu0 %vm1407_vm1, %v1406_v1 }
  0x5e   : > { %1248 = vmatmul.mubr.msk.f32.gmra.mxu1 %vm246_vm0, %v220_v38 }
  0x5f   : > { %1250 = vmatprep.mubr.msk.f32.mxu1 %vm1407_vm1, %v1406_v1 }
  0x60   : > { %1155 = vmatmul.mubr.msk.f32.gmra.mxu0 %vm246_vm0, %v189_v39 }
  0x61   : > { %1157 = vmatprep.mubr.msk.f32.mxu0 %vm1407_vm1, %v1406_v1 }
  0x62   : > { %1251 = vmatmul.mubr.msk.f32.gmra.mxu1 %vm246_vm0, %v221_v40 }
  0x63   : > { %1253 = vmatprep.mubr.msk.f32.mxu1 %vm1407_vm1, %v1406_v1 }
  0x64   : > { %1158 = vmatmul.mubr.msk.f32.gmra.mxu0 %vm246_vm0, %v190_v41 }
  0x65   : > { %1160 = vmatprep.mubr.msk.f32.mxu0 %vm1407_vm1, %v1406_v1 }
  0x66   : > { %1254 = vmatmul.mubr.msk.f32.gmra.mxu1 %vm246_vm0, %v222_v42 }
  0x67   : > { %1256 = vmatprep.mubr.msk.f32.mxu1 %vm1407_vm1, %v1406_v1 }
  0x68   : > { %1161 = vmatmul.mubr.msk.f32.gmra.mxu0 %vm246_vm0, %v191_v43 }
  0x69   : > { %1163 = vmatprep.mubr.msk.f32.mxu0 %vm1407_vm1, %v1406_v1 }
  0x6a   : > { %1257 = vmatmul.mubr.msk.f32.gmra.mxu1 %vm246_vm0, %v223_v44 }
  0x6b   : > { %1259 = vmatprep.mubr.msk.f32.mxu1 %vm1407_vm1, %v1406_v1 }
  0x6c   : > { %1164 = vmatmul.mubr.msk.f32.gmra.mxu0 %vm246_vm0, %v192_v45 }
  0x6d   : > { %1166 = vmatprep.mubr.msk.f32.mxu0 %vm1407_vm1, %v1406_v1 }
  0x6e   : > { %1260 = vmatmul.mubr.msk.f32.gmra.mxu1 %vm246_vm0, %v224_v46 }
  0x6f   : > { %1262 = vmatprep.mubr.msk.f32.mxu1 %vm1407_vm1, %v1406_v1 }
  0x70   : > { %1167 = vmatmul.mubr.msk.f32.gmra.mxu0 %vm246_vm0, %v193_v47 }
  0x71   : > { %1169 = vmatprep.mubr.msk.f32.mxu0 %vm1407_vm1, %v1406_v1 }
  0x72   : > { %1263 = vmatmul.mubr.msk.f32.gmra.mxu1 %vm246_vm0, %v225_v48 }
  0x73   : > { %1265 = vmatprep.mubr.msk.f32.mxu1 %vm1407_vm1, %v1406_v1 }
  0x74   : > { %1170 = vmatmul.mubr.msk.f32.gmra.mxu0 %vm246_vm0, %v194_v49 }
  0x75   : > { %1172 = vmatprep.mubr.msk.f32.mxu0 %vm1407_vm1, %v1406_v1 }
  0x76   : > { %1266 = vmatmul.mubr.msk.f32.gmra.mxu1 %vm246_vm0, %v226_v50 }
  0x77   : > { %1268 = vmatprep.mubr.msk.f32.mxu1 %vm1407_vm1, %v1406_v1 }
  0x78   : > { %1173 = vmatmul.mubr.msk.f32.gmra.mxu0 %vm246_vm0, %v195_v51 }
  0x79   : > { %1175 = vmatprep.mubr.msk.f32.mxu0 %vm1407_vm1, %v1406_v1 }
  0x7a   : > { %1269 = vmatmul.mubr.msk.f32.gmra.mxu1 %vm246_vm0, %v227_v52 }
  0x7b   : > { %1271 = vmatprep.mubr.msk.f32.mxu1 %vm1407_vm1, %v1406_v1 }
  0x7c   : > { %1176 = vmatmul.mubr.msk.f32.gmra.mxu0 %vm246_vm0, %v196_v53 }
  0x7d   : > { %1178 = vmatprep.mubr.msk.f32.mxu0 %vm1407_vm1, %v1406_v1 }
  0x7e   : > { %1272 = vmatmul.mubr.msk.f32.gmra.mxu1 %vm246_vm0, %v228_v54 }
  0x7f   : > { %1274 = vmatprep.mubr.msk.f32.mxu1 %vm1407_vm1, %v1406_v1 }
  0x80   : > { %1179 = vmatmul.mubr.msk.f32.gmra.mxu0 %vm246_vm0, %v197_v55 }
  0x81   : > { %1181 = vmatprep.mubr.msk.f32.mxu0 %vm1407_vm1, %v1406_v1 }
  0x82   : > { %1275 = vmatmul.mubr.msk.f32.gmra.mxu1 %vm246_vm0, %v229_v56 }
  0x83   : > { %1277 = vmatprep.mubr.msk.f32.mxu1 %vm1407_vm1, %v1406_v1 }
  0x84   : > { %1182 = vmatmul.mubr.msk.f32.gmra.mxu0 %vm246_vm0, %v198_v57 }
  0x85   : > { %1184 = vmatprep.mubr.msk.f32.mxu0 %vm1407_vm1, %v1406_v1 }
  0x86   : > { %1278 = vmatmul.mubr.msk.f32.gmra.mxu1 %vm246_vm0, %v230_v58 }
  0x87   : > { %1280 = vmatprep.mubr.msk.f32.mxu1 %vm1407_vm1, %v1406_v1 }
  0x88   : > { %1185 = vmatmul.mubr.msk.f32.gmra.mxu0 %vm246_vm0, %v199_v59 }
  0x89   : > { %1187 = vmatprep.mubr.msk.f32.mxu0 %vm1407_vm1, %v1406_v1 }
  0x8a   : > { %1281 = vmatmul.mubr.msk.f32.gmra.mxu1 %vm246_vm0, %v231_v60 }
  0x8b   : > { %1283 = vmatprep.mubr.msk.f32.mxu1 %vm1407_vm1, %v1406_v1 }
  0x8c   : > { %1188 = vmatmul.mubr.msk.f32.gmra.mxu0 %vm246_vm0, %v200_v61 }
  0x8d   : > { %1190 = vmatprep.mubr.msk.f32.mxu0 %vm1407_vm1, %v1406_v1 }
  0x8e   : > { %1284 = vmatmul.mubr.msk.f32.gmra.mxu1 %vm246_vm0, %v232_v62 }
  0x8f   : > { %1286 = vmatprep.mubr.msk.f32.mxu1 %vm1407_vm1, %v1406_v1 }
  0x90   : > { %1191 = vmatmul.mubr.msk.f32.gmra.mxu0 %vm246_vm0, %v201_v63 }
  0x91   : > { %1193 = vmatprep.mubr.msk.f32.mxu0 %vm1407_vm1, %v1406_v1 }
  0x92   : > { %1287 = vmatmul.mubr.msk.f32.gmra.mxu1 %vm246_vm0, %v233_v0 }
  0x93   : > { %1289 = vmatprep.mubr.msk.f32.mxu1 %vm1407_vm1, %v1406_v1 }
  0x94   : > { %1194 = vmatmul.mubr.msk.f32.gmra.mxu0 %vm246_vm0, %v202_v2 }
  0x95   : > { %1196 = vmatprep.mubr.msk.f32.mxu0 %vm1407_vm1, %v1406_v1 }
  0x96   : > { %1290 = vmatmul.mubr.msk.f32.gmra.mxu1 %vm246_vm0, %v234_v3 }
  0x98   : > { %1197 = vmatmul.mubr.msk.f32.gmra.mxu0 %vm246_vm0, %v203_v4 }
  0xdc   : > { %v502_v6 = vpop.f32.mrf.mxu0 }
  0xdd   : > { %v503_v7 = vadd.f32 %v1763_v5, %v502_v6 }
  0xde   : > { %v1105_v8 = vpop.f32.mrf.mxu0  ;;  %v662_v9 = vpop.f32.mrf.mxu1 }
  0xdf   : > { %816 = vst [vmem:[%s1766_s20] sm:$0xff] %v503_v7  ;;  %v663_v1 = vadd.f32 %v1763_v5, %v662_v9 }
  0xe0   : > { %v507_v10 = vpop.f32.mrf.mxu0  ;;  %v1201_v11 = vpop.f32.mrf.mxu1 }
  0xe1   : > { %848 = vst [vmem:[%s1766_s20 + $0x100] sm:$0xff] %v663_v1  ;;  %v508_v12 = vadd.f32 %v1763_v5, %v507_v10 }
  0xe2   : > { %v1108_v13 = vpop.f32.mrf.mxu0  ;;  %v667_v14 = vpop.f32.mrf.mxu1 }
  0xe3   : > { %817 = vst [vmem:[%s1766_s20 + $0x8] sm:$0xff] %v508_v12  ;;  %v668_v15 = vadd.f32 %v1763_v5, %v667_v14 }
  0xe4   : > { %v512_v16 = vpop.f32.mrf.mxu0  ;;  %v1204_v17 = vpop.f32.mrf.mxu1 }
  0xe5   : > { %849 = vst [vmem:[%s1766_s20 + $0x108] sm:$0xff] %v668_v15  ;;  %v513_v18 = vadd.f32 %v1763_v5, %v512_v16 }
  0xe6   : > { %v1111_v19 = vpop.f32.mrf.mxu0  ;;  %v672_v20 = vpop.f32.mrf.mxu1 }
  0xe7   : > { %818 = vst [vmem:[%s1766_s20 + $0x10] sm:$0xff] %v513_v18  ;;  %v673_v21 = vadd.f32 %v1763_v5, %v672_v20 }
  0xe8   : > { %v517_v22 = vpop.f32.mrf.mxu0  ;;  %v1207_v23 = vpop.f32.mrf.mxu1 }
  0xe9   : > { %850 = vst [vmem:[%s1766_s20 + $0x110] sm:$0xff] %v673_v21  ;;  %v518_v24 = vadd.f32 %v1763_v5, %v517_v22 }
  0xea   : > { %v1114_v25 = vpop.f32.mrf.mxu0  ;;  %v677_v26 = vpop.f32.mrf.mxu1 }
  0xeb   : > { %819 = vst [vmem:[%s1766_s20 + $0x18] sm:$0xff] %v518_v24  ;;  %v678_v27 = vadd.f32 %v1763_v5, %v677_v26 }
  0xec   : > { %v522_v28 = vpop.f32.mrf.mxu0  ;;  %v1210_v29 = vpop.f32.mrf.mxu1 }
  0xed   : > { %851 = vst [vmem:[%s1766_s20 + $0x118] sm:$0xff] %v678_v27  ;;  %v523_v30 = vadd.f32 %v1763_v5, %v522_v28 }
  0xee   : > { %v1117_v31 = vpop.f32.mrf.mxu0  ;;  %v682_v32 = vpop.f32.mrf.mxu1 }
  0xef   : > { %820 = vst [vmem:[%s1766_s20 + $0x20] sm:$0xff] %v523_v30  ;;  %v683_v33 = vadd.f32 %v1763_v5, %v682_v32 }
  0xf0   : > { %v527_v34 = vpop.f32.mrf.mxu0  ;;  %v1213_v35 = vpop.f32.mrf.mxu1 }
  0xf1   : > { %852 = vst [vmem:[%s1766_s20 + $0x120] sm:$0xff] %v683_v33  ;;  %v528_v36 = vadd.f32 %v1763_v5, %v527_v34 }
  0xf2   : > { %v1120_v37 = vpop.f32.mrf.mxu0  ;;  %v687_v38 = vpop.f32.mrf.mxu1 }
  0xf3   : > { %821 = vst [vmem:[%s1766_s20 + $0x28] sm:$0xff] %v528_v36  ;;  %v688_v39 = vadd.f32 %v1763_v5, %v687_v38 }
  0xf4   : > { %v532_v40 = vpop.f32.mrf.mxu0  ;;  %v1216_v41 = vpop.f32.mrf.mxu1 }
  0xf5   : > { %853 = vst [vmem:[%s1766_s20 + $0x128] sm:$0xff] %v688_v39  ;;  %v533_v42 = vadd.f32 %v1763_v5, %v532_v40 }
  0xf6   : > { %v1123_v43 = vpop.f32.mrf.mxu0  ;;  %v692_v44 = vpop.f32.mrf.mxu1 }
  0xf7   : > { %822 = vst [vmem:[%s1766_s20 + $0x30] sm:$0xff] %v533_v42  ;;  %v693_v45 = vadd.f32 %v1763_v5, %v692_v44 }
  0xf8   : > { %v537_v46 = vpop.f32.mrf.mxu0  ;;  %v1219_v47 = vpop.f32.mrf.mxu1 }
  0xf9   : > { %854 = vst [vmem:[%s1766_s20 + $0x130] sm:$0xff] %v693_v45  ;;  %v538_v48 = vadd.f32 %v1763_v5, %v537_v46 }
  0xfa   : > { %v1126_v49 = vpop.f32.mrf.mxu0  ;;  %v697_v50 = vpop.f32.mrf.mxu1 }
  0xfb   : > { %823 = vst [vmem:[%s1766_s20 + $0x38] sm:$0xff] %v538_v48  ;;  %v698_v51 = vadd.f32 %v1763_v5, %v697_v50 }
  0xfc   : > { %v542_v52 = vpop.f32.mrf.mxu0  ;;  %v1222_v53 = vpop.f32.mrf.mxu1 }
  0xfd   : > { %855 = vst [vmem:[%s1766_s20 + $0x138] sm:$0xff] %v698_v51  ;;  %v543_v54 = vadd.f32 %v1763_v5, %v542_v52 }
  0xfe   : > { %v1129_v55 = vpop.f32.mrf.mxu0  ;;  %v702_v56 = vpop.f32.mrf.mxu1 }
  0xff   : > { %824 = vst [vmem:[%s1766_s20 + $0x40] sm:$0xff] %v543_v54  ;;  %v703_v57 = vadd.f32 %v1763_v5, %v702_v56 }
 0x100   : > { %v547_v58 = vpop.f32.mrf.mxu0  ;;  %v1225_v59 = vpop.f32.mrf.mxu1 }
 0x101   : > { %856 = vst [vmem:[%s1766_s20 + $0x140] sm:$0xff] %v703_v57  ;;  %v548_v60 = vadd.f32 %v1763_v5, %v547_v58 }
 0x102   : > { %v1132_v61 = vpop.f32.mrf.mxu0  ;;  %v707_v62 = vpop.f32.mrf.mxu1 }
 0x103   : > { %825 = vst [vmem:[%s1766_s20 + $0x48] sm:$0xff] %v548_v60  ;;  %v708_v63 = vadd.f32 %v1763_v5, %v707_v62 }
 0x104   : > { %v552_v0 = vpop.f32.mrf.mxu0  ;;  %v1228_v2 = vpop.f32.mrf.mxu1 }
 0x105   : > { %857 = vst [vmem:[%s1766_s20 + $0x148] sm:$0xff] %v708_v63  ;;  %v553_v3 = vadd.f32 %v1763_v5, %v552_v0 }
 0x106   : > { %v1135_v4 = vpop.f32.mrf.mxu0  ;;  %v712_v6 = vpop.f32.mrf.mxu1 }
 0x107   : > { %826 = vst [vmem:[%s1766_s20 + $0x50] sm:$0xff] %v553_v3  ;;  %v713_v7 = vadd.f32 %v1763_v5, %v712_v6 }
 0x108   : > { %v557_v8 = vpop.f32.mrf.mxu0  ;;  %v1231_v9 = vpop.f32.mrf.mxu1 }
 0x109   : > { %858 = vst [vmem:[%s1766_s20 + $0x150] sm:$0xff] %v713_v7  ;;  %v558_v1 = vadd.f32 %v1763_v5, %v557_v8 }
 0x10a   : > { %v1138_v10 = vpop.f32.mrf.mxu0  ;;  %v717_v11 = vpop.f32.mrf.mxu1 }
 0x10b   : > { %827 = vst [vmem:[%s1766_s20 + $0x58] sm:$0xff] %v558_v1  ;;  %v718_v12 = vadd.f32 %v1763_v5, %v717_v11 }
 0x10c   : > { %v562_v13 = vpop.f32.mrf.mxu0  ;;  %v1234_v14 = vpop.f32.mrf.mxu1 }
 0x10d   : > { %859 = vst [vmem:[%s1766_s20 + $0x158] sm:$0xff] %v718_v12  ;;  %v563_v15 = vadd.f32 %v1763_v5, %v562_v13 }
 0x10e   : > { %v1141_v16 = vpop.f32.mrf.mxu0  ;;  %v722_v17 = vpop.f32.mrf.mxu1 }
 0x10f   : > { %828 = vst [vmem:[%s1766_s20 + $0x60] sm:$0xff] %v563_v15  ;;  %v723_v18 = vadd.f32 %v1763_v5, %v722_v17 }
 0x110   : > { %v567_v19 = vpop.f32.mrf.mxu0  ;;  %v1237_v20 = vpop.f32.mrf.mxu1 }
 0x111   : > { %860 = vst [vmem:[%s1766_s20 + $0x160] sm:$0xff] %v723_v18  ;;  %v568_v21 = vadd.f32 %v1763_v5, %v567_v19 }
 0x112   : > { %v1144_v22 = vpop.f32.mrf.mxu0  ;;  %v727_v23 = vpop.f32.mrf.mxu1 }
 0x113   : > { %829 = vst [vmem:[%s1766_s20 + $0x68] sm:$0xff] %v568_v21  ;;  %v728_v24 = vadd.f32 %v1763_v5, %v727_v23 }
 0x114   : > { %v572_v25 = vpop.f32.mrf.mxu0  ;;  %v1240_v26 = vpop.f32.mrf.mxu1 }
 0x115   : > { %861 = vst [vmem:[%s1766_s20 + $0x168] sm:$0xff] %v728_v24  ;;  %v573_v27 = vadd.f32 %v1763_v5, %v572_v25 }
 0x116   : > { %v1147_v28 = vpop.f32.mrf.mxu0  ;;  %v732_v29 = vpop.f32.mrf.mxu1 }
 0x117   : > { %830 = vst [vmem:[%s1766_s20 + $0x70] sm:$0xff] %v573_v27  ;;  %v733_v30 = vadd.f32 %v1763_v5, %v732_v29 }
 0x118   : > { %v577_v31 = vpop.f32.mrf.mxu0  ;;  %v1243_v32 = vpop.f32.mrf.mxu1 }
 0x119   : > { %862 = vst [vmem:[%s1766_s20 + $0x170] sm:$0xff] %v733_v30  ;;  %v578_v33 = vadd.f32 %v1763_v5, %v577_v31 }
 0x11a   : > { %v1150_v34 = vpop.f32.mrf.mxu0  ;;  %v737_v35 = vpop.f32.mrf.mxu1 }
 0x11b   : > { %831 = vst [vmem:[%s1766_s20 + $0x78] sm:$0xff] %v578_v33  ;;  %v738_v36 = vadd.f32 %v1763_v5, %v737_v35 }
 0x11c   : > { %v582_v37 = vpop.f32.mrf.mxu0  ;;  %v1246_v38 = vpop.f32.mrf.mxu1 }
 0x11d   : > { %863 = vst [vmem:[%s1766_s20 + $0x178] sm:$0xff] %v738_v36  ;;  %v583_v39 = vadd.f32 %v1763_v5, %v582_v37 }
 0x11e   : > { %v1153_v40 = vpop.f32.mrf.mxu0  ;;  %v742_v41 = vpop.f32.mrf.mxu1 }
 0x11f   : > { %832 = vst [vmem:[%s1766_s20 + $0x80] sm:$0xff] %v583_v39  ;;  %v743_v42 = vadd.f32 %v1763_v5, %v742_v41 }
 0x120   : > { %v587_v43 = vpop.f32.mrf.mxu0  ;;  %v1249_v44 = vpop.f32.mrf.mxu1 }
 0x121   : > { %864 = vst [vmem:[%s1766_s20 + $0x180] sm:$0xff] %v743_v42  ;;  %v588_v45 = vadd.f32 %v1763_v5, %v587_v43 }
 0x122   : > { %v1156_v46 = vpop.f32.mrf.mxu0  ;;  %v747_v47 = vpop.f32.mrf.mxu1 }
 0x123   : > { %833 = vst [vmem:[%s1766_s20 + $0x88] sm:$0xff] %v588_v45  ;;  %v748_v48 = vadd.f32 %v1763_v5, %v747_v47 }
 0x124   : > { %v592_v49 = vpop.f32.mrf.mxu0  ;;  %v1252_v50 = vpop.f32.mrf.mxu1 }
 0x125   : > { %865 = vst [vmem:[%s1766_s20 + $0x188] sm:$0xff] %v748_v48  ;;  %v593_v51 = vadd.f32 %v1763_v5, %v592_v49 }
 0x126   : > { %v1159_v52 = vpop.f32.mrf.mxu0  ;;  %v752_v53 = vpop.f32.mrf.mxu1 }
 0x127   : > { %834 = vst [vmem:[%s1766_s20 + $0x90] sm:$0xff] %v593_v51  ;;  %v753_v54 = vadd.f32 %v1763_v5, %v752_v53 }
 0x128   : > { %v597_v55 = vpop.f32.mrf.mxu0  ;;  %v1255_v56 = vpop.f32.mrf.mxu1 }
 0x129   : > { %866 = vst [vmem:[%s1766_s20 + $0x190] sm:$0xff] %v753_v54  ;;  %v598_v57 = vadd.f32 %v1763_v5, %v597_v55 }
 0x12a   : > { %v1162_v58 = vpop.f32.mrf.mxu0  ;;  %v757_v59 = vpop.f32.mrf.mxu1 }
 0x12b   : > { %835 = vst [vmem:[%s1766_s20 + $0x98] sm:$0xff] %v598_v57  ;;  %v758_v60 = vadd.f32 %v1763_v5, %v757_v59 }
 0x12c   : > { %v602_v61 = vpop.f32.mrf.mxu0  ;;  %v1258_v62 = vpop.f32.mrf.mxu1 }
 0x12d   : > { %867 = vst [vmem:[%s1766_s20 + $0x198] sm:$0xff] %v758_v60  ;;  %v603_v63 = vadd.f32 %v1763_v5, %v602_v61 }
 0x12e   : > { %v1165_v0 = vpop.f32.mrf.mxu0  ;;  %v762_v2 = vpop.f32.mrf.mxu1 }
 0x12f   : > { %836 = vst [vmem:[%s1766_s20 + $0xa0] sm:$0xff] %v603_v63  ;;  %v763_v3 = vadd.f32 %v1763_v5, %v762_v2 }
 0x130   : > { %v607_v4 = vpop.f32.mrf.mxu0  ;;  %v1261_v6 = vpop.f32.mrf.mxu1 }
 0x131   : > { %868 = vst [vmem:[%s1766_s20 + $0x1a0] sm:$0xff] %v763_v3  ;;  %v608_v7 = vadd.f32 %v1763_v5, %v607_v4 }
 0x132   : > { %v1168_v8 = vpop.f32.mrf.mxu0  ;;  %v767_v9 = vpop.f32.mrf.mxu1 }
 0x133   : > { %837 = vst [vmem:[%s1766_s20 + $0xa8] sm:$0xff] %v608_v7  ;;  %v768_v1 = vadd.f32 %v1763_v5, %v767_v9 }
 0x134   : > { %v612_v10 = vpop.f32.mrf.mxu0  ;;  %v1264_v11 = vpop.f32.mrf.mxu1 }
 0x135   : > { %869 = vst [vmem:[%s1766_s20 + $0x1a8] sm:$0xff] %v768_v1  ;;  %v613_v12 = vadd.f32 %v1763_v5, %v612_v10 }
 0x136   : > { %v1171_v13 = vpop.f32.mrf.mxu0  ;;  %v772_v14 = vpop.f32.mrf.mxu1 }
 0x137   : > { %838 = vst [vmem:[%s1766_s20 + $0xb0] sm:$0xff] %v613_v12  ;;  %v773_v15 = vadd.f32 %v1763_v5, %v772_v14 }
 0x138   : > { %v617_v16 = vpop.f32.mrf.mxu0  ;;  %v1267_v17 = vpop.f32.mrf.mxu1 }
 0x139   : > { %870 = vst [vmem:[%s1766_s20 + $0x1b0] sm:$0xff] %v773_v15  ;;  %v618_v18 = vadd.f32 %v1763_v5, %v617_v16 }
 0x13a   : > { %v1174_v19 = vpop.f32.mrf.mxu0  ;;  %v777_v20 = vpop.f32.mrf.mxu1 }
 0x13b   : > { %839 = vst [vmem:[%s1766_s20 + $0xb8] sm:$0xff] %v618_v18  ;;  %v778_v21 = vadd.f32 %v1763_v5, %v777_v20 }
 0x13c   : > { %v622_v22 = vpop.f32.mrf.mxu0  ;;  %v1270_v23 = vpop.f32.mrf.mxu1 }
 0x13d   : > { %871 = vst [vmem:[%s1766_s20 + $0x1b8] sm:$0xff] %v778_v21  ;;  %v623_v24 = vadd.f32 %v1763_v5, %v622_v22 }
 0x13e   : > { %v1177_v25 = vpop.f32.mrf.mxu0  ;;  %v782_v26 = vpop.f32.mrf.mxu1 }
 0x13f   : > { %840 = vst [vmem:[%s1766_s20 + $0xc0] sm:$0xff] %v623_v24  ;;  %v783_v27 = vadd.f32 %v1763_v5, %v782_v26 }
 0x140   : > { %v627_v28 = vpop.f32.mrf.mxu0  ;;  %v1273_v29 = vpop.f32.mrf.mxu1 }
 0x141   : > { %872 = vst [vmem:[%s1766_s20 + $0x1c0] sm:$0xff] %v783_v27  ;;  %v628_v30 = vadd.f32 %v1763_v5, %v627_v28 }
 0x142   : > { %v1180_v31 = vpop.f32.mrf.mxu0  ;;  %v787_v32 = vpop.f32.mrf.mxu1 }
 0x143   : > { %841 = vst [vmem:[%s1766_s20 + $0xc8] sm:$0xff] %v628_v30  ;;  %v788_v33 = vadd.f32 %v1763_v5, %v787_v32 }
 0x144   : > { %v632_v34 = vpop.f32.mrf.mxu0  ;;  %v1276_v35 = vpop.f32.mrf.mxu1 }
 0x145   : > { %873 = vst [vmem:[%s1766_s20 + $0x1c8] sm:$0xff] %v788_v33  ;;  %v633_v36 = vadd.f32 %v1763_v5, %v632_v34 }
 0x146   : > { %v1183_v37 = vpop.f32.mrf.mxu0  ;;  %v792_v38 = vpop.f32.mrf.mxu1 }
 0x147   : > { %842 = vst [vmem:[%s1766_s20 + $0xd0] sm:$0xff] %v633_v36  ;;  %v793_v39 = vadd.f32 %v1763_v5, %v792_v38 }
 0x148   : > { %v637_v40 = vpop.f32.mrf.mxu0  ;;  %v1279_v41 = vpop.f32.mrf.mxu1 }
 0x149   : > { %874 = vst [vmem:[%s1766_s20 + $0x1d0] sm:$0xff] %v793_v39  ;;  %v638_v42 = vadd.f32 %v1763_v5, %v637_v40 }
 0x14a   : > { %v1186_v43 = vpop.f32.mrf.mxu0  ;;  %v797_v44 = vpop.f32.mrf.mxu1 }
 0x14b   : > { %843 = vst [vmem:[%s1766_s20 + $0xd8] sm:$0xff] %v638_v42  ;;  %v798_v45 = vadd.f32 %v1763_v5, %v797_v44 }
 0x14c   : > { %v642_v46 = vpop.f32.mrf.mxu0  ;;  %v1282_v47 = vpop.f32.mrf.mxu1 }
 0x14d   : > { %875 = vst [vmem:[%s1766_s20 + $0x1d8] sm:$0xff] %v798_v45  ;;  %v643_v48 = vadd.f32 %v1763_v5, %v642_v46 }
 0x14e   : > { %v1189_v49 = vpop.f32.mrf.mxu0  ;;  %v802_v50 = vpop.f32.mrf.mxu1 }
 0x14f   : > { %844 = vst [vmem:[%s1766_s20 + $0xe0] sm:$0xff] %v643_v48  ;;  %v803_v51 = vadd.f32 %v1763_v5, %v802_v50 }
 0x150   : > { %v647_v52 = vpop.f32.mrf.mxu0  ;;  %v1285_v53 = vpop.f32.mrf.mxu1 }
 0x151   : > { %876 = vst [vmem:[%s1766_s20 + $0x1e0] sm:$0xff] %v803_v51  ;;  %v648_v54 = vadd.f32 %v1763_v5, %v647_v52 }
 0x152   : > { %v1192_v55 = vpop.f32.mrf.mxu0  ;;  %v807_v56 = vpop.f32.mrf.mxu1 }
 0x153   : > { %845 = vst [vmem:[%s1766_s20 + $0xe8] sm:$0xff] %v648_v54  ;;  %v808_v57 = vadd.f32 %v1763_v5, %v807_v56 }
 0x154   : > { %v652_v58 = vpop.f32.mrf.mxu0  ;;  %v1288_v59 = vpop.f32.mrf.mxu1 }
 0x155   : > { %877 = vst [vmem:[%s1766_s20 + $0x1e8] sm:$0xff] %v808_v57  ;;  %v653_v60 = vadd.f32 %v1763_v5, %v652_v58 }
 0x156   : > { %v1195_v61 = vpop.f32.mrf.mxu0  ;;  %v812_v62 = vpop.f32.mrf.mxu1 }
 0x157   : > { %846 = vst [vmem:[%s1766_s20 + $0xf0] sm:$0xff] %v653_v60  ;;  %v813_v63 = vadd.f32 %v1763_v5, %v812_v62 }
 0x158   : > { %v657_v0 = vpop.f32.mrf.mxu0  ;;  %v1291_v2 = vpop.f32.mrf.mxu1 }
 0x159   : > { %878 = vst [vmem:[%s1766_s20 + $0x1f0] sm:$0xff] %v813_v63  ;;  %v658_v3 = vadd.f32 %v1763_v5, %v657_v0 }
 0x15a   : > { %v1198_v4 = vpop.f32.mrf.mxu0 }
 0x15b   : > { %847 = vst [vmem:[%s1766_s20 + $0xf8] sm:$0xff] %v658_v3 }
 0x15c   : > { %1357 = shalt.err (!%p1354_p3)
}
 0x15d   : > { %s1358_s6 = scalar_lea.hbm %s1895_s28, 8064  ;;  %s1362_s9 = scalar_lea.hbm %s1947_s3, 16128 }
 0x15e   : > { %p1359_p4 = scmp.ne.s32.totalorder %s1895_s28, %s1358_s6  ;;  %p1363_p9 = scmp.lt.s32.totalorder %s1895_s28, %s1947_s3 }
 0x15f   : > { %p1364_p10 = scmp.lt.s32.totalorder %s1362_s9, %s1358_s6 }
 0x160   : > { %p1360_p7 = pnand %p1359_p4, %p1469_p5 }
 0x161   : > { %p1365_p11 = por %p1364_p10, %p1363_p9 }
 0x162   : > { %p1361_p8 = pneg %p1360_p7 }
 0x164   : > { %p1366_p12 = pnand %p1365_p11, %p1361_p8 }
 0x166   : > { %1369 = shalt.err (!%p1366_p12)
}
 0x167   : > { %s1409_s17 = smov 128   ;;  %s1410_s19 = smov 8  }
 0x168   : > { %1301 = dma.vmem_to_hbm [thread:$0]  (%p1469_p5), %s1897_s25, 8064, %s1895_s28, %s1904_s16, %s1409_s17, %s1409_s17, %s1410_s19  }
 0x169 PF: > { %p1307_p13 = scmp.ge.s32.totalorder %s1404_s15, 2  ;;  %s908_s20 = sand.u32 1, %s1392_s12  }
 0x16a   : > { %s909_s24 = scalar_lea.sflag [#allocation3], %s908_s20 }
 0x16b   : > { %p1304_p0 = pnand %p1307_p13, %p1473_p6 }
 0x16d   : > { %p1305_p1 = pneg %p1304_p0 }
 0x16f   : > { %1387 = dma.done.wait (%p1305_p1), %s909_s24, 8064  }
 0x170   : > { %1389 = vsyncadd (%p1305_p1), %s909_s24, 4294959232  ;;  %p13_p2 = scmp.ge.s32.totalorder %s1456_s18, 4   ;;  %s1950_s12 = smov %s1396_s13 }
 0x171   : > { %s1951_s13 = smov %s1400_s14  ;;  %s1952_s14 = smov %s1467_s21 }
 0x172   : > { %s1953_s15 = smov %s1456_s18  ;;  %15 = sbr.rel (!%p13_p2) target bundleno = 3 (0x3), region = 67 }
 0x177   :  { %914 = vsyncpa [#allocation3], 1 }
 0x178   :  { %916 = vsyncpa [#allocation3 + $0x1], 1 }

</bundles_post_ra>
